<compile_context>
chip_gen: v7x
topology: tpu7x:2x2x1
jax: 0.10.0
libtpu: 0.0.40
codegen_flags: <defaults>
</compile_context>

<pallas_src>
import functools

import jax
import jax.numpy as jnp
from jax.experimental import pallas as pl
from jax.experimental.pallas import tpu as pltpu


def _round_up(x: int, m: int) -> int:
    return ((x + m - 1) // m) * m


def update_gcn_kernel(x_ref, w1_ref, b1_ref, w2_ref, b2_ref, w3_ref, b3_ref, out_ref):
    # x_ref: [TILE_N, M*F] bf16 — the neighbor mean is already folded into w1.
    x = x_ref[...]

    # layer 1: Linear + (Dropout = identity at inference) + ReLU
    h = jnp.dot(x, w1_ref[...], preferred_element_type=jnp.float32) + b1_ref[...]
    h = jnp.maximum(h, 0.0)

    # layer 2: Linear + (Dropout = identity at inference) + ReLU
    h = jnp.dot(h.astype(jnp.bfloat16), w2_ref[...],
                preferred_element_type=jnp.float32) + b2_ref[...]
    h = jnp.maximum(h, 0.0)

    # output layer: Linear (narrow O columns — no lane-padding written back)
    y = jnp.dot(h.astype(jnp.bfloat16), w3_ref[...],
                preferred_element_type=jnp.float32) + b3_ref[...]
    out_ref[...] = y.astype(out_ref.dtype)
    # TODO(synk): training-mode Dropout (stochastic masking via pltpu.prng_*) not
    # implemented; forward here matches eval()-mode semantics.


@functools.partial(jax.jit, static_argnames=("tile_n",))
def update_gcn(message, w1, b1, w2, b2, w3, b3, *, tile_n: int = 4096):
    """message: [N, M, F]; weights stored pre-transposed as [in, out]."""
    N, M, F = message.shape
    H = w1.shape[1]
    O = w3.shape[1]
    MF = M * F

    # ---- Fold the neighbor mean into W1:  mean_m(msg) @ w1 == msg_flat @ (tile(w1)/M)
    w1_fold = jnp.tile(w1, (M, 1)) / jnp.float32(M)          # [M*F, H]

    # ---- Pad the hidden dim to an MXU-friendly multiple of 128 (zero padding is
    #      exact through ReLU).  The output stays narrow: w3 is padded only along
    #      its K dim, so we never write 128-wide padding zeros back to HBM.
    H_pad = _round_up(H, 128)
    w1p = jnp.pad(w1_fold, ((0, 0), (0, H_pad - H))).astype(jnp.bfloat16)
    b1p = jnp.pad(b1,      ((0, 0), (0, H_pad - H)))
    w2p = jnp.pad(w2,      ((0, H_pad - H), (0, H_pad - H))).astype(jnp.bfloat16)
    b2p = jnp.pad(b2,      ((0, 0), (0, H_pad - H)))
    w3p = jnp.pad(w3,      ((0, H_pad - H), (0, 0))).astype(jnp.bfloat16)

    # ---- Lane-dense [N, M*F] slab streamed in bf16 (halves the dominant HBM read).
    #      No host-side N padding: grid uses cdiv and Pallas masks the partial last
    #      block (row-wise compute -> garbage tail rows are discarded on writeback).
    x = message.reshape(N, MF).astype(jnp.bfloat16)

    # Keep >=2 grid steps whenever possible so v7x's two TensorCores both get work
    # under dimension_semantics=("parallel",); on v5e/v6e this is harmless.
    TILE_N = max(8, min(tile_n, _round_up((N + 1) // 2, 8)))
    grid = (pl.cdiv(N, TILE_N),)

    out = pl.pallas_call(
        update_gcn_kernel,
        out_shape=jax.ShapeDtypeStruct((N, O), jnp.float32),
        grid=grid,
        in_specs=[
            # message stream: one TILE_N-row slab per grid step (double-buffered DMA)
            pl.BlockSpec((TILE_N, MF), lambda i: (i, 0)),
            # weights / biases: constant index_map -> resident in VMEM across steps
            pl.BlockSpec((MF, H_pad), lambda i: (0, 0)),
            pl.BlockSpec((1, H_pad), lambda i: (0, 0)),
            pl.BlockSpec((H_pad, H_pad), lambda i: (0, 0)),
            pl.BlockSpec((1, H_pad), lambda i: (0, 0)),
            pl.BlockSpec((H_pad, O), lambda i: (0, 0)),
            pl.BlockSpec((1, O), lambda i: (0, 0)),
        ],
        out_specs=pl.BlockSpec((TILE_N, O), lambda i: (i, 0)),
        compiler_params=pltpu.CompilerParams(
            dimension_semantics=("parallel",),
        ),
    )(x, w1p, b1p, w2p, b2p, w3p, b3)

    return out


def reference(message, w1, b1, w2, b2, w3, b3):
    x = jnp.mean(message, axis=1)
    h = jnp.maximum(x @ w1 + b1, 0.0)
    h = jnp.maximum(h @ w2 + b2, 0.0)
    return h @ w3 + b3


if __name__ == "__main__":
    # Small shapes consistent with the module:
    #   n_updated_features=32, hidden_units=100, num_layers=2, output_units=1
    N, M, F = 24, 4, 32         # nodes, neighbors, features
    H, O = 100, 1               # hidden units, output units

    key = jax.random.PRNGKey(0)
    k_msg, k1, k2, k3, kb1, kb2, kb3 = jax.random.split(key, 7)

    message = jax.random.normal(k_msg, (N, M, F), dtype=jnp.float32)

    # Deterministic parameter init (weights stored pre-transposed as [in, out]).
    w1 = jax.random.normal(k1, (F, H), dtype=jnp.float32) * 0.1
    b1 = jax.random.normal(kb1, (1, H), dtype=jnp.float32) * 0.01
    w2 = jax.random.normal(k2, (H, H), dtype=jnp.float32) * 0.1
    b2 = jax.random.normal(kb2, (1, H), dtype=jnp.float32) * 0.01
    w3 = jax.random.normal(k3, (H, O), dtype=jnp.float32) * 0.1
    b3 = jax.random.normal(kb3, (1, O), dtype=jnp.float32) * 0.01

    ref = reference(message, w1, b1, w2, b2, w3, b3)

    # Default tile: TILE_N=16 -> 2 grid steps with a partial (masked) last block.
    out = update_gcn(message, w1, b1, w2, b2, w3, b3)
    jax.block_until_ready(out)
    assert out.shape == (N, O)
    # bf16 streaming with f32 accumulation -> relaxed tolerance vs the f32 reference.
    assert jnp.allclose(out, ref, atol=2e-2, rtol=2e-2)

    # Small tile exercises 3 full grid steps as well.
    out2 = update_gcn(message, w1, b1, w2, b2, w3, b3, tile_n=8)
    jax.block_until_ready(out2)
    assert jnp.allclose(out2, ref, atol=2e-2, rtol=2e-2)

    print("KERNEL_OK")
</pallas_src>

<mosaic_0001>
module attributes {stable_mosaic.version = 11 : i64} {
  func.func @update_gcn_kernel(%arg0: i32, %arg1: memref<16x128xbf16, #tpu.memory_space<vmem>>, %arg2: memref<128x128xbf16, #tpu.memory_space<vmem>>, %arg3: memref<1x128xf32, #tpu.memory_space<vmem>>, %arg4: memref<128x128xbf16, #tpu.memory_space<vmem>>, %arg5: memref<1x128xf32, #tpu.memory_space<vmem>>, %arg6: memref<128x1xbf16, #tpu.memory_space<vmem>>, %arg7: memref<1x1xf32, #tpu.memory_space<vmem>>, %arg8: memref<16x1xf32, #tpu.memory_space<vmem>>) attributes {dimension_semantics = [#tpu.dimension_semantics<parallel>], iteration_bounds = array<i64: 2>, scalar_prefetch = 0 : i64, scratch_operands = 0 : i64, tpu.core_type = #tpu.core_type<tc>, window_params = [{transform_indices = @transform_0, window_bounds = array<i64: 16, 128>}, {pipeline_mode = #tpu.pipeline_mode<synchronous>, transform_indices = @transform_1, window_bounds = array<i64: 128, 128>}, {pipeline_mode = #tpu.pipeline_mode<synchronous>, transform_indices = @transform_2, window_bounds = array<i64: 1, 128>}, {pipeline_mode = #tpu.pipeline_mode<synchronous>, transform_indices = @transform_3, window_bounds = array<i64: 128, 128>}, {pipeline_mode = #tpu.pipeline_mode<synchronous>, transform_indices = @transform_4, window_bounds = array<i64: 1, 128>}, {pipeline_mode = #tpu.pipeline_mode<synchronous>, transform_indices = @transform_5, window_bounds = array<i64: 128, 1>}, {pipeline_mode = #tpu.pipeline_mode<synchronous>, transform_indices = @transform_6, window_bounds = array<i64: 1, 1>}, {transform_indices = @transform_7, window_bounds = array<i64: 16, 1>}]} {
    %c0 = arith.constant 0 : index
    %c0_0 = arith.constant 0 : index
    %0 = vector.load %arg1[%c0, %c0_0] : memref<16x128xbf16, #tpu.memory_space<vmem>>, vector<16x128xbf16>
    %c0_1 = arith.constant 0 : index
    %c0_2 = arith.constant 0 : index
    %1 = vector.load %arg2[%c0_1, %c0_2] : memref<128x128xbf16, #tpu.memory_space<vmem>>, vector<128x128xbf16>
    %cst = arith.constant dense<0.000000e+00> : vector<16x128xf32>
    %2 = tpu.matmul %0, %1, %cst {dimension_numbers = #tpu.dot_dimension_numbers<[1], [0], [0], [1], [0, 0, 1, 1], [], []>} : vector<16x128xbf16>, vector<128x128xbf16>, vector<16x128xf32> -> vector<16x128xf32>
    %c0_3 = arith.constant 0 : index
    %c0_4 = arith.constant 0 : index
    %3 = vector.load %arg3[%c0_3, %c0_4] : memref<1x128xf32, #tpu.memory_space<vmem>>, vector<1x128xf32>
    %4 = vector.broadcast %3 : vector<1x128xf32> to vector<16x128xf32>
    %5 = arith.addf %2, %4 : vector<16x128xf32>
    %cst_5 = arith.constant 0.000000e+00 : f32
    %6 = vector.broadcast %cst_5 : f32 to vector<16x128xf32>
    %7 = arith.maximumf %5, %6 : vector<16x128xf32>
    %8 = arith.truncf %7 : vector<16x128xf32> to vector<16x128xbf16>
    %c0_6 = arith.constant 0 : index
    %c0_7 = arith.constant 0 : index
    %9 = vector.load %arg4[%c0_6, %c0_7] : memref<128x128xbf16, #tpu.memory_space<vmem>>, vector<128x128xbf16>
    %cst_8 = arith.constant dense<0.000000e+00> : vector<16x128xf32>
    %10 = tpu.matmul %8, %9, %cst_8 {dimension_numbers = #tpu.dot_dimension_numbers<[1], [0], [0], [1], [0, 0, 1, 1], [], []>} : vector<16x128xbf16>, vector<128x128xbf16>, vector<16x128xf32> -> vector<16x128xf32>
    %c0_9 = arith.constant 0 : index
    %c0_10 = arith.constant 0 : index
    %11 = vector.load %arg5[%c0_9, %c0_10] : memref<1x128xf32, #tpu.memory_space<vmem>>, vector<1x128xf32>
    %12 = vector.broadcast %11 : vector<1x128xf32> to vector<16x128xf32>
    %13 = arith.addf %10, %12 : vector<16x128xf32>
    %cst_11 = arith.constant 0.000000e+00 : f32
    %14 = vector.broadcast %cst_11 : f32 to vector<16x128xf32>
    %15 = arith.maximumf %13, %14 : vector<16x128xf32>
    %16 = arith.truncf %15 : vector<16x128xf32> to vector<16x128xbf16>
    %c0_12 = arith.constant 0 : index
    %c0_13 = arith.constant 0 : index
    %17 = vector.load %arg6[%c0_12, %c0_13] : memref<128x1xbf16, #tpu.memory_space<vmem>>, vector<128x1xbf16>
    %cst_14 = arith.constant dense<0.000000e+00> : vector<16x1xf32>
    %18 = tpu.matmul %16, %17, %cst_14 {dimension_numbers = #tpu.dot_dimension_numbers<[1], [0], [0], [1], [0, 0, 1, 1], [], []>} : vector<16x128xbf16>, vector<128x1xbf16>, vector<16x1xf32> -> vector<16x1xf32>
    %c0_15 = arith.constant 0 : index
    %c0_16 = arith.constant 0 : index
    %19 = vector.load %arg7[%c0_15, %c0_16] : memref<1x1xf32, #tpu.memory_space<vmem>>, vector<1x1xf32>
    %20 = vector.broadcast %19 : vector<1x1xf32> to vector<16x1xf32>
    %21 = arith.addf %18, %20 : vector<16x1xf32>
    %c0_17 = arith.constant 0 : index
    %c0_18 = arith.constant 0 : index
    %22 = vector.load %arg8[%c0_17, %c0_18] : memref<16x1xf32, #tpu.memory_space<vmem>>, vector<16x1xf32>
    tpu.vector_store %arg8[%c0_17, %c0_18], %21 {strides = array<i32>} : memref<16x1xf32, #tpu.memory_space<vmem>>, vector<16x1xf32>,
    return
  }
  func.func @transform_0(%arg0: i32) -> (i32, i32) {
    %c0_i32 = arith.constant 0 : i32
    %c0_i32_0 = arith.constant 0 : i32
    return %arg0, %c0_i32 : i32, i32
  }
  func.func @transform_1(%arg0: i32) -> (i32, i32) {
    %c0_i32 = arith.constant 0 : i32
    %c0_i32_0 = arith.constant 0 : i32
    %c0_i32_1 = arith.constant 0 : i32
    return %c0_i32, %c0_i32_0 : i32, i32
  }
  func.func @transform_2(%arg0: i32) -> (i32, i32) {
    %c0_i32 = arith.constant 0 : i32
    %c0_i32_0 = arith.constant 0 : i32
    %c0_i32_1 = arith.constant 0 : i32
    return %c0_i32, %c0_i32_0 : i32, i32
  }
  func.func @transform_3(%arg0: i32) -> (i32, i32) {
    %c0_i32 = arith.constant 0 : i32
    %c0_i32_0 = arith.constant 0 : i32
    %c0_i32_1 = arith.constant 0 : i32
    return %c0_i32, %c0_i32_0 : i32, i32
  }
  func.func @transform_4(%arg0: i32) -> (i32, i32) {
    %c0_i32 = arith.constant 0 : i32
    %c0_i32_0 = arith.constant 0 : i32
    %c0_i32_1 = arith.constant 0 : i32
    return %c0_i32, %c0_i32_0 : i32, i32
  }
  func.func @transform_5(%arg0: i32) -> (i32, i32) {
    %c0_i32 = arith.constant 0 : i32
    %c0_i32_0 = arith.constant 0 : i32
    %c0_i32_1 = arith.constant 0 : i32
    return %c0_i32, %c0_i32_0 : i32, i32
  }
  func.func @transform_6(%arg0: i32) -> (i32, i32) {
    %c0_i32 = arith.constant 0 : i32
    %c0_i32_0 = arith.constant 0 : i32
    %c0_i32_1 = arith.constant 0 : i32
    return %c0_i32, %c0_i32_0 : i32, i32
  }
  func.func @transform_7(%arg0: i32) -> (i32, i32) {
    %c0_i32 = arith.constant 0 : i32
    %c0_i32_0 = arith.constant 0 : i32
    return %arg0, %c0_i32 : i32, i32
  }
}

</mosaic_0001>

<bundles_post_ra>
// kernel: update_gcn.1
= control target key start
LH: loop header
LB: loop body
LE: loop exit
PB: predicated region body
PF: predicated region fallthrough
CT: control target
= control target key end

     0   :  { %s1459_s0 = inlined_call_operand.vmem [shape: bf16[24,128], index: 0, kind: input, shape index: {}]   ;;  %s1460_s1 = inlined_call_operand.vmem [shape: bf16[128,128], index: 1, kind: input, shape index: {}]   ;;  %s1461_s2 = inlined_call_operand.vmem [shape: f32[1,128], index: 2, kind: input, shape index: {}]   ;;  %s1462_s3 = inlined_call_operand.vmem [shape: bf16[128,128], index: 3, kind: input, shape index: {}]   ;;  %s1463_s4 = inlined_call_operand.vmem [shape: f32[1,128], index: 4, kind: input, shape index: {}]   ;;  %s1464_s5 = inlined_call_operand.vmem [shape: bf16[128,1], index: 5, kind: input, shape index: {}]   ;;  %s1465_s6 = inlined_call_operand.<no memory space> [shape: f32[1,1], index: 6, kind: input, shape index: {}]   ;;  %s1466_s7 = inlined_call_operand.vmem [shape: f32[24,1], index: 7, kind: output, shape index: {}]  }
   0x1   :  { %v12_v0 = vstv %s1465_s6 }
   0x2   :  { %13 = vst [vmem:[#allocation2] sm:$0x1] %v12_v0 }
   0x3   :  { %s1265_s26 = smov 0   ;;  %s1267_s27 = smov 0  }
   0x4   :  { %s1269_s28 = smov 0  }
   0x5 LB: > { %s1278_s6 = sadd.s32 4294967295, %s1186_s28   ;;  %s1280_s29 = sadd.s32 1, %s1186_s28   ;;  %s1186_s28 = sphi %s1269_s28, %s1470_s28   ;;  %s1182_s27 = sphi %s1267_s27, %s1469_s27   ;;  %s1178_s26 = sphi %s1265_s26, %s1468_s26  }
   0x6   : > { %s175_s30 = ssub.s32 %s1186_s28, %s1280_s29  ;;  %s178_s8 = sadd.s32 1, %s1182_s27 }
   0x7   : > { %p176_p0 = scmp.eq.s32.totalorder %s175_s30, 0  ;;  %p188_p1 = scmp.ne.s32.totalorder %s1182_s27, %s1178_s26 }
   0x8   : > { %p189_p2 = scmp.eq.s32.totalorder %s1278_s6, 1  ;;  %p878_p3 = scmp.ge.s32.totalorder %s1186_s28, 1 }
   0x9   : > { %s1288_s9 = scalar_select %p176_p0, %s1182_s27, %s178_s8  }
   0xa   : > { %p1290_p4 = por %p189_p2, %p188_p1  ;;  %p248_p5 = scmp.lt.s32.totalorder %s1186_s28, 3 }
   0xc   : > { %p249_p6 = pnand %p878_p3, %p248_p5 }
   0xd   : > { %v1107_v1 = vld [vmem:[%s1460_s1] sm:$0xff] (!%p249_p6)   ;;  %v1220_v2 = vmov (!%p249_p6), 0.0   ;;  %v1108_v3 = vld [vmem:[%s1460_s1 + $0x8] sm:$0xff] (!%p249_p6)   ;;  %vm1221_vm0 = vmmov (!%p249_p6), 0   ;;  %s1305_s15 = sshll.u32 (!%p249_p6), %s1278_s6, 1  ;;  %v1109_v4 = vld [vmem:[%s1460_s1 + $0x10] sm:$0xff] (!%p249_p6)  }
   0xe   : > { %252 = sbr.rel (%p249_p6) target bundleno = 752 (0x2f0), region = 48  ;;  %957 = vmatprep.subr.bf16.mxu0 (!%p249_p6), %v1220_v2  ;;  %977 = vmatprep.subr.bf16.mxu1 (!%p249_p6), %v1220_v2  ;;  %p288_p7 = scmp.lt.s32.totalorder (!%p249_p6), %s1305_s15, 2  ;;  %v1116_v5 = vld [vmem:[%s1462_s3] sm:$0xff] (!%p249_p6)   ;;  %v1110_v6 = vld [vmem:[%s1460_s1 + $0x18] sm:$0xff] (!%p249_p6)   ;;  %v1117_v7 = vld [vmem:[%s1462_s3 + $0x8] sm:$0xff] (!%p249_p6)   ;;  %vm653_vm1 = vcmask (!%p249_p6), 7168  }
   0xf   : > { %958 = vmatpush3.bf16.msra.mxu0 (!%p249_p6), %v1107_v1  ;;  %973 = vmatprep.mubr.msk.bf16.mxu0 (!%p249_p6), %vm1221_vm0, %v1220_v2  ;;  %v1111_v8 = vld [vmem:[%s1460_s1 + $0x20] sm:$0xff] (!%p249_p6)   ;;  %v1118_v9 = vld [vmem:[%s1462_s3 + $0x10] sm:$0xff] (!%p249_p6)   ;;  %v1112_v10 = vld [vmem:[%s1460_s1 + $0x28] sm:$0xff] (!%p249_p6)   ;;  %s280_s18 = sand.u32 (!%p249_p6), 1, %s1178_s26  }
  0x10   : > { %959 = vmatprep.subr.bf16.mxu0 (!%p249_p6), %v1220_v2  ;;  %993 = vmatprep.mubr.msk.bf16.mxu1 (!%p249_p6), %vm1221_vm0, %v1220_v2  ;;  %v1119_v11 = vld [vmem:[%s1462_s3 + $0x18] sm:$0xff] (!%p249_p6)   ;;  %v1113_v12 = vld [vmem:[%s1460_s1 + $0x30] sm:$0xff] (!%p249_p6)   ;;  %v1120_v13 = vld [vmem:[%s1462_s3 + $0x20] sm:$0xff] (!%p249_p6)  }
  0x11   : > { %978 = vmatpush3.bf16.msra.mxu1 (!%p249_p6), %v1116_v5  ;;  %v1114_v14 = vld [vmem:[%s1460_s1 + $0x38] sm:$0xff] (!%p249_p6)   ;;  %v1121_v15 = vld [vmem:[%s1462_s3 + $0x28] sm:$0xff] (!%p249_p6)   ;;  %v1122_v17 = vld [vmem:[%s1462_s3 + $0x30] sm:$0xff] (!%p249_p6)  }
  0x12   : > { %979 = vmatprep.subr.bf16.mxu1 (!%p249_p6), %v1220_v2  ;;  %v1123_v18 = vld [vmem:[%s1462_s3 + $0x38] sm:$0xff] (!%p249_p6)   ;;  %v1124_v19 = vld [vmem:[%s1464_s5] sm:$0xff] (!%p249_p6)   ;;  %v1125_v20 = vld [vmem:[%s1464_s5 + $0x8] sm:$0xff] (!%p249_p6)  }
  0x13   : > { %960 = vmatpush3.bf16.msra.mxu0 (!%p249_p6), %v1108_v3  ;;  %v1126_v21 = vld [vmem:[%s1464_s5 + $0x10] sm:$0xff] (!%p249_p6)   ;;  %v1127_v22 = vld [vmem:[%s1464_s5 + $0x18] sm:$0xff] (!%p249_p6)   ;;  %v1128_v23 = vld [vmem:[%s1464_s5 + $0x20] sm:$0xff] (!%p249_p6)  }
  0x14   : > { %961 = vmatprep.subr.bf16.mxu0 (!%p249_p6), %v1220_v2  ;;  %v1129_v24 = vld [vmem:[%s1464_s5 + $0x28] sm:$0xff] (!%p249_p6)   ;;  %v882_v25 = vld [vmem:[%s1461_s2] ss:$0 sm:$0xff] (!%p249_p6)  ;;  %v1130_v35 = vld [vmem:[%s1464_s5 + $0x30] sm:$0xff] (!%p249_p6)  }
  0x15   : > { %s289_s16 = scalar_select %p288_p7, %s1305_s15, 2  ;;  %980 = vmatpush3.bf16.msra.mxu1 %v1117_v7  ;;  %v1131_v36 = vld [vmem:[%s1464_s5 + $0x38] sm:$0xff]   ;;  %v892_v37 = vld [vmem:[%s1463_s4] ss:$0 sm:$0xff] }
  0x16   : > { %981 = vmatprep.subr.bf16.mxu1 %v1220_v2  ;;  %v901_v47 = vld [vmem:[#allocation2] ss:$0 sm:$0xff]  ;;  %s664_s26 = ssub.s32 (%p1290_p4), 3, %s1305_s15  ;;  %s927_s21 = sshll.u32 (%p1290_p4), %s1278_s6, 4 }
  0x17   : > { %s881_s19 = sshll.u32 %s289_s16, 2  ;;  %962 = vmatpush3.bf16.msra.mxu0 %v1109_v4  ;;  %p665_p8 = scmp.lt.s32.totalorder (%p1290_p4), %s664_s26, 2 }
  0x18   : > { %s1319_s22 = scalar_lea.vmem %s1459_s0, %s881_s19  ;;  %963 = vmatprep.subr.bf16.mxu0 %v1220_v2  ;;  %s879_s19 = sshll.u32 %s280_s18, 4 }
  0x19   : > { %982 = vmatpush3.bf16.msra.mxu1 %v1118_v9  ;;  %v1115_v16 = vld [vmem:[%s1319_s22] sm:$0xff]   ;;  %s1414_s20 = scalar_lea.vmem [#allocation3], %s879_s19   ;;  %s1425_s25 = scalar_lea.vmem (%p1290_p4), %s1466_s7, %s927_s21  }
  0x1a   : > { %983 = vmatprep.subr.bf16.mxu1 %v1220_v2 }
  0x1b   : > { %964 = vmatpush3.bf16.msra.mxu0 %v1110_v6 }
  0x1c   : > { %965 = vmatprep.subr.bf16.mxu0 %v1220_v2 }
  0x1d   : > { %984 = vmatpush3.bf16.msra.mxu1 %v1119_v11 }
  0x1e   : > { %985 = vmatprep.subr.bf16.mxu1 %v1220_v2 }
  0x1f   : > { %966 = vmatpush3.bf16.msra.mxu0 %v1111_v8 }
  0x20   : > { %967 = vmatprep.subr.bf16.mxu0 %v1220_v2 }
  0x21   : > { %986 = vmatpush3.bf16.msra.mxu1 %v1120_v13 }
  0x22   : > { %987 = vmatprep.subr.bf16.mxu1 %v1220_v2 }
  0x23   : > { %968 = vmatpush3.bf16.msra.mxu0 %v1112_v10 }
  0x24   : > { %969 = vmatprep.subr.bf16.mxu0 %v1220_v2 }
  0x25   : > { %988 = vmatpush3.bf16.msra.mxu1 %v1121_v15 }
  0x26   : > { %989 = vmatprep.subr.bf16.mxu1 %v1220_v2 }
  0x27   : > { %970 = vmatpush3.bf16.msra.mxu0 %v1113_v12 }
  0x28   : > { %971 = vmatprep.subr.bf16.mxu0 %v1220_v2 }
  0x29   : > { %990 = vmatpush3.bf16.msra.mxu1 %v1122_v17 }
  0x2a   : > { %991 = vmatprep.subr.bf16.mxu1 %v1220_v2 }
  0x2b   : > { %972 = vmatpush3.bf16.msra.mxu0 %v1114_v14 }
  0x2c   : > { %997 = vmatprep.subr.bf16.mxu0 %v1220_v2 }
  0x2d   : > { %992 = vmatpush3.bf16.msra.mxu1 %v1123_v18 }
  0x2e   : > { %974 = vmatmul.mubr.bf16.vlgmr.msra.gmra.mrb[0].mxu0 %v1115_v16 }
  0x2f   : > { %1013 = vmatprep.mubr.msk.bf16.mxu0 %vm1221_vm0, %v1220_v2  ;;  %998 = vmatpush3.bf16.msra.mxu0 %v1124_v19 }
  0x30   : > { %999 = vmatprep.subr.bf16.mxu0 %v1220_v2 }
  0x33   : > { %1000 = vmatpush3.bf16.msra.mxu0 %v1125_v20 }
  0x34   : > { %1001 = vmatprep.subr.bf16.mxu0 %v1220_v2 }
  0x37   : > { %1002 = vmatpush3.bf16.msra.mxu0 %v1126_v21 }
  0x38   : > { %1003 = vmatprep.subr.bf16.mxu0 %v1220_v2 }
  0x3b   : > { %1004 = vmatpush3.bf16.msra.mxu0 %v1127_v22 }
  0x3c   : > { %1005 = vmatprep.subr.bf16.mxu0 %v1220_v2 }
  0x3f   : > { %1006 = vmatpush3.bf16.msra.mxu0 %v1128_v23 }
  0x40   : > { %1007 = vmatprep.subr.bf16.mxu0 %v1220_v2 }
  0x43   : > { %1008 = vmatpush3.bf16.msra.mxu0 %v1129_v24 }
  0x44   : > { %1009 = vmatprep.subr.bf16.mxu0 %v1220_v2 }
  0x47   : > { %1010 = vmatpush3.bf16.msra.mxu0 %v1130_v35 }
  0x48   : > { %1011 = vmatprep.subr.bf16.mxu0 %v1220_v2 }
  0x4b   : > { %1012 = vmatpush3.bf16.msra.mxu0 %v1131_v36 }
 0x101   : > { %v416_v26 = vpop.f32.mrb[0].mxu0 }
 0x102   : > { %v417_v27 = vadd.f32 %v882_v25, %v416_v26  ;;  %v975_v28 = vpop.f32.mrb[1].mxu0 }
 0x103   : > { %v419_v29 = vpop.f32.mrb[2].mxu0 }
 0x104   : > { %v420_v30 = vadd.f32 %v882_v25, %v419_v29  ;;  %v976_v31 = vpop.f32.mrb[3].mxu0  ;;  %v423_v32 = vmax.f32 %v417_v27, 0.0 }
 0x106   : > { %v424_v33 = vmax.f32 %v420_v30, 0.0 }
 0x108   : > { %v425_v34 = vpack.c.bf16 %v424_v33, %v423_v32 }
 0x10a   : > { %994 = vmatmul.mubr.bf16.vlgmr.msra.gmra.mrb[0].mxu1 %v425_v34 }
 0x1dd   : > { %v531_v38 = vpop.f32.mrb[0].mxu1 }
 0x1de   : > { %v532_v39 = vadd.f32 %v892_v37, %v531_v38  ;;  %v995_v40 = vpop.f32.mrb[1].mxu1 }
 0x1df   : > { %v534_v41 = vpop.f32.mrb[2].mxu1 }
 0x1e0   : > { %v535_v42 = vadd.f32 %v892_v37, %v534_v41  ;;  %v996_v43 = vpop.f32.mrb[3].mxu1  ;;  %v538_v44 = vmax.f32 %v532_v39, 0.0 }
 0x1e2   : > { %v539_v45 = vmax.f32 %v535_v42, 0.0 }
 0x1e4   : > { %v540_v46 = vpack.c.bf16 %v539_v45, %v538_v44 }
 0x1e6   : > { %1014 = vmatmul.mubr.bf16.vlgmr.msra.gmra.mrb[4].mxu0 %v540_v46 }
 0x2b8   : > { %662 = sbr.rel (!%p1290_p4) target bundleno = 752 (0x2f0), region = 52 }
 0x2b9   : > { %v646_v48 = vpop.f32.mrb[4].mxu0 }
 0x2ba   : > { %v647_v49 = vadd.f32 %v901_v47, %v646_v48  ;;  %v1015_v50 = vpop.f32.mrb[5].mxu0 }
 0x2bb   : > { %v649_v51 = vpop.f32.mrb[6].mxu0 }
 0x2bc   : > { %654 = vst.msk [vmem:[%s1414_s20] sm:$0xff] %vm653_vm1, %v647_v49  ;;  %v650_v52 = vadd.f32 %v901_v47, %v649_v51  ;;  %v1016_v53 = vpop.f32.mrb[7].mxu0 }
 0x2be   : > { %655 = vst.msk [vmem:[%s1414_s20 + $0x8] sm:$0xff] %vm653_vm1, %v650_v52 }
 0x2bf   : > { %s1472_s26 = smov (!%p665_p8, %s664_s26), 2 }
 0x2c0   : > { %s912_s28 = sshll.u32 %s1472_s26, 7 }
 0x2c1   : > { %p915_p9 = scmp.eq.s32.totalorder %s912_s28, 0 }
 0x2c2   : > { %s1431_s30 = sshrl.u32 (!%p915_p9), %s1472_s26, 1 }
 0x2c3   : > { %673 = sbr.rel (%p915_p9) target bundleno = 752 (0x2f0), region = 56  ;;  %p916_p10 = scmp.le.s32.totalorder (!%p915_p9), %s1431_s30, 0 }
 0x2ca   : > { %831 = sbr.rel (%p916_p10) target bundleno = 731 (0x2db), region = 132  ;;  %s1188_s6 = smov (!%p916_p10), %s1425_s25  }
 0x2cb   : > { %s1192_s10 = smov (!%p916_p10), %s1414_s20   ;;  %s1196_s15 = smov (!%p916_p10), 0  }
 0x2cc   : > { %s1200_s8 = smov (!%p916_p10), 0  }
 0x2d1 LB: >> { %v737_v54 = vld [vmem:[%s1194_s10] sm:$0xff]  ;;  %v739_v55 = vld [vmem:[%s1194_s10 + $0x8] sm:$0xff]  ;;  %s741_s11 = sadd.s32 1, %s1198_s15  ;;  %s731_s8 = sadd.s32 1, %s1202_s8   ;;  %s1202_s8 = sphi %s1200_s8, %s731_s8   ;;  %s1198_s15 = sphi %s1196_s15, %s1197_s15   ;;  %s1194_s10 = sphi %s1192_s10, %s746_s10   ;;  %s1190_s6 = sphi %s1188_s6, %s747_s6  }
 0x2d2   : >> { %738 = vst [vmem:[%s1190_s6] sm:$0xff] %v737_v54  ;;  %740 = vst [vmem:[%s1190_s6 + $0x8] sm:$0xff] %v739_v55  ;;  %p742_p11 = scmp.ge.s32.totalorder %s741_s11, %s1431_s30  ;;  %p730_p12 = scmp.ge.s32.totalorder %s731_s8, %s1431_s30 }
 0x2d4   : >> { %s1474_s11 = smov (%p742_p11, %s741_s11), 0  ;;  %733 = sbr.rel (!%p730_p12) target bundleno = 721 (0x2d1), region = 138 }
 0x2d5   : >> { %s917_s12 = sshll.u32 %s1474_s11, 4  ;;  %s1197_s15 = smov %s1474_s11  }
 0x2d6   : >> { %s746_s10 = scalar_lea.vmem %s1414_s20, %s917_s12 [#allocation3]   ;;  %s747_s6 = scalar_lea.vmem %s1425_s25, %s917_s12  }
 0x2db PF: > { %s1441_s13 = sand.u32 1, %s1472_s26   ;;  %s928_s14 = sshll.u32 %s1431_s30, 4 }
 0x2dc   : > { %s752_s22 = scalar_lea.vmem %s1414_s20, %s928_s14 [#allocation3]   ;;  %s754_s16 = scalar_lea.vmem %s1425_s25, %s928_s14  }
 0x2dd   : > { %p922_p13 = scmp.le.s32.totalorder %s1441_s13, 0 }
 0x2de   : > { %s1204_s17 = smov (!%p922_p13), %s754_s16   ;;  %s1208_s18 = smov (!%p922_p13), %s752_s22  }
 0x2df   : > { %845 = sbr.rel (%p922_p13) target bundleno = 752 (0x2f0), region = 143  ;;  %s1212_s19 = smov (!%p922_p13), 0  }
 0x2e0   : > { %s1216_s21 = smov (!%p922_p13), 0  }
 0x2e6 LB: >> { %v764_v56 = vld [vmem:[%s1210_s18] sm:$0xff]  ;;  %s766_s26 = sadd.s32 1, %s1214_s19  ;;  %s758_s21 = sadd.s32 1, %s1218_s21   ;;  %s1218_s21 = sphi %s1216_s21, %s758_s21   ;;  %s1214_s19 = sphi %s1212_s19, %s1213_s19   ;;  %s1210_s18 = sphi %s1208_s18, %s771_s18   ;;  %s1206_s17 = sphi %s1204_s17, %s772_s17  }
 0x2e7   : >> { %765 = vst [vmem:[%s1206_s17] sm:$0xff] %v764_v56  ;;  %p767_p0 = scmp.ge.s32.totalorder %s766_s26, %s1441_s13  ;;  %p757_p1 = scmp.ge.s32.totalorder %s758_s21, %s1441_s13 }
 0x2e9   : >> { %s1476_s26 = smov (%p767_p0, %s766_s26), 0  ;;  %760 = sbr.rel (!%p757_p1) target bundleno = 742 (0x2e6), region = 149 }
 0x2ea   : >> { %s923_s20 = sshll.u32 %s1476_s26, 3  ;;  %s1213_s19 = smov %s1476_s26  }
 0x2eb   : >> { %s771_s18 = scalar_lea.vmem %s752_s22, %s923_s20 [#allocation3]   ;;  %s772_s17 = scalar_lea.vmem %s754_s16, %s923_s20  }
 0x2f0 PF: > { %p16_p2 = scmp.ge.s32.totalorder %s1280_s29, 4   ;;  %s1468_s26 = smov %s1182_s27 }
 0x2f1   : > { %s1469_s27 = smov %s1288_s9  ;;  %s1470_s28 = smov %s1280_s29 }
 0x2f2   :  { %18 = sbr.rel (!%p16_p2) target bundleno = 5 (0x5), region = 160 }

</bundles_post_ra>
